<compile_context>
chip_gen: v5e
topology: v5e:2x2
jax: 0.10.0
libtpu: 0.0.40
codegen_flags: <defaults>
</compile_context>

<pallas_src>
import numpy as np
import jax
import jax.numpy as jnp
from jax.experimental import pallas as pl
from jax.experimental.pallas import tpu as pltpu  # noqa: F401  (TPU backend assumed)

# ----------------------------- problem constants -----------------------------
COLORS = ['red', 'green', 'blue', 'purple', 'yellow', 'grey']
TYPES = ['door', 'key', 'ball', 'box']
PRED_IDX = {f'is-{c}': i for i, c in enumerate(COLORS)}
PRED_IDX.update({f'is-{t}': 6 + i for i, t in enumerate(TYPES)})
PRED_IDX['is-open'] = 10
PRED_IDX['hands-free'] = 11
N_PRED = 12                     # predicates actually used
P_OUT = 128                     # lane-dense predicate-head width (first N_PRED used)

OBJECT_NAMES = ['r', 'wall:0', 'door:0', 'key:0', 'ball:0', 'box:0', 'door:1', 'wall:1']
OBJ_IDX = {n: i for i, n in enumerate(OBJECT_NAMES)}
N_OBJ = len(OBJECT_NAMES)

S = 8                           # number of states (timesteps)
A = S - 1                       # number of actions
C, H, W = 3, 8, 8               # per-object NCHW image
D_IN = C * H * W                # 192
D_H = 128                       # hidden width of the predicate encoder (lane-dense)

ACTION_TYPES = ['forward', 'lturn', 'rturn', 'toggle', 'pickup', 'place', 'toggle-tool', 'noop']
N_ACTION_TYPES = len(ACTION_TYPES)

L_PAD = 128                     # lane width of the fused loss bank


# ----------------------------- Pallas kernels ---------------------------------
def _predicate_kernel(x_ref, w1_ref, b1_ref, w2_ref, b2_ref, out_ref):
    """Fused per-object encoder + predicate heads + sigmoid; one MXU pass over all rows."""
    h = jnp.dot(x_ref[...], w1_ref[...], preferred_element_type=jnp.float32) + b1_ref[...]
    h = jnp.maximum(h, 0.0)
    logits = jnp.dot(h, w2_ref[...], preferred_element_type=jnp.float32) + b2_ref[...]
    out_ref[...] = jax.nn.sigmoid(logits)


def predicate_forward(x, w1, b1, w2, b2):
    # Total resident data (inputs + weights + output) is ~200 KiB: it all fits in VMEM
    # on v5e/v6e/v7x, so there is no grid — a single launch, full blocks, and a
    # lane-dense (R, 128) output (unmasked stores).
    R = x.shape[0]
    return pl.pallas_call(
        _predicate_kernel,
        out_shape=jax.ShapeDtypeStruct((R, P_OUT), jnp.float32),
    )(x, w1, b1, w2, b2)


def _loss_bank_kernel(pred_ref, target_ref, valid_ref, mode_ref, out_ref):
    """Single pass over every loss term.

    Each row is either a pn-balanced BCE-with-probs term (mode=0) or a SmoothL1
    'sum'-reduction action-effect term (mode=1).  Padded lanes / rows carry valid=0
    and contribute nothing.
    """
    p = pred_ref[...]                      # [K, L]
    t = target_ref[...]
    v = valid_ref[...]
    mode = mode_ref[...]                   # [K, 1]
    eps = jnp.float32(1e-8)

    # positive/negative-balanced BCE with probabilities
    bce = -(t * jnp.log(p + eps) + (1.0 - t) * jnp.log(1.0 - p + eps))
    pos = jnp.where(t > 0.5, v, 0.0)
    neg = v - pos
    nr_pos = jnp.maximum(jnp.sum(pos, axis=1, keepdims=True), 1.0)
    nr_neg = jnp.maximum(jnp.sum(neg, axis=1, keepdims=True), 1.0)
    w = pos / nr_pos + neg / nr_neg
    loss_bce = 0.5 * jnp.sum(bce * w, axis=1, keepdims=True)

    # SmoothL1 (beta=1, reduction='sum')
    d = p - t
    ad = jnp.abs(d)
    hub = jnp.where(ad < 1.0, 0.5 * d * d, ad - 0.5)
    loss_hub = jnp.sum(hub * v, axis=1, keepdims=True)

    loss = jnp.where(mode > 0.5, loss_hub, loss_bce)          # [K, 1]
    # lane-dense broadcast store (avoids masked partial stores of a (K, 1) output)
    out_ref[...] = jnp.broadcast_to(loss, out_ref.shape)


def loss_bank_forward(pred, target, valid, mode):
    K = pred.shape[0]
    out = pl.pallas_call(
        _loss_bank_kernel,
        out_shape=jax.ShapeDtypeStruct((K, L_PAD), jnp.float32),
    )(pred, target, valid, mode)
    return out[:, 0]


# ----------------------------- parameters -------------------------------------
def init_params(key):
    k1, k2, k3 = jax.random.split(key, 3)
    w1 = jax.random.normal(k1, (D_IN, D_H), jnp.float32) / jnp.sqrt(jnp.float32(D_IN))
    b1 = jnp.zeros((1, D_H), jnp.float32)
    w2 = jax.random.normal(k2, (D_H, P_OUT), jnp.float32) / jnp.sqrt(jnp.float32(D_H))
    b2 = jnp.zeros((1, P_OUT), jnp.float32)
    effect_delta = 0.1 * jax.random.normal(k3, (N_ACTION_TYPES, 2), jnp.float32)
    return {'w1': w1, 'b1': b1, 'w2': w2, 'b2': b2, 'effect_delta': effect_delta}


# ----------------------------- forward-context emulation ----------------------
class ForwardCtx:
    def __init__(self):
        self.total = jnp.float32(0.0)
        self.monitors = {}

    def add_loss(self, loss, name, accumulate):
        key = f'loss/{name}'
        self.monitors[key] = self.monitors.get(key, jnp.float32(0.0)) + loss
        if accumulate is not False and accumulate is not None:
            self.total = self.total + jnp.float32(accumulate) * loss

    def add_accuracy(self, acc, name):
        self.monitors[f'acc/{name}'] = acc

    def finalize(self):
        return {'loss': self.total, 'monitors': self.monitors}


# ----------------------------- fused loss bank ---------------------------------
class LossBank:
    """Collects every (pred, target) loss row and reduces them with ONE pallas_call."""

    def __init__(self):
        self._pred, self._target, self._valid, self._mode = [], [], [], []
        self._meta = []          # per row: (scale, [(name, accumulate), ...])

    @staticmethod
    def _pad(vec, fill):
        vec = jnp.asarray(vec, jnp.float32).reshape(-1)
        n = vec.shape[0]
        assert n <= L_PAD
        if n == L_PAD:
            return vec, n
        return jnp.concatenate([vec, jnp.full((L_PAD - n,), jnp.float32(fill))]), n

    def _add(self, pred_vec, target_vec, mode, scale, entries):
        p, n = self._pad(pred_vec, 0.5)      # 0.5 keeps log() finite on padded lanes
        t, _ = self._pad(target_vec, 0.0)
        self._pred.append(p)
        self._target.append(t)
        self._valid.append(jnp.concatenate(
            [jnp.ones((n,), jnp.float32), jnp.zeros((L_PAD - n,), jnp.float32)]))
        self._mode.append(float(mode))
        self._meta.append((float(scale), entries))

    def add_bce(self, pred_vec, target_vec, name, scale, accumulate):
        self._add(pred_vec, target_vec, 0.0, scale, [(name, accumulate)])

    def add_huber(self, pred_vec, target_vec, entries, scale=1.0):
        self._add(pred_vec, target_vec, 1.0, scale, entries)

    def reduce_into(self, ctx):
        if not self._meta:
            return
        k = len(self._meta)
        k_pad = ((k + 7) // 8) * 8            # pad row count to a sublane multiple
        for _ in range(k_pad - k):
            self._pred.append(jnp.full((L_PAD,), jnp.float32(0.5)))
            self._target.append(jnp.zeros((L_PAD,), jnp.float32))
            self._valid.append(jnp.zeros((L_PAD,), jnp.float32))
            self._mode.append(0.0)
        pred = jnp.stack(self._pred)
        target = jnp.stack(self._target)
        valid = jnp.stack(self._valid)
        mode = jnp.asarray(self._mode, jnp.float32).reshape(k_pad, 1)
        losses = loss_bank_forward(pred, target, valid, mode)   # one kernel launch
        for i, (scale, entries) in enumerate(self._meta):
            li = losses[i] * scale
            for name, accumulate in entries:
                ctx.add_loss(li, name, accumulate)


# ----------------------------- ABILModel forward -------------------------------
def abil_forward(params, feed_dict, task, count,
                 goal_loss_weight=1.0, action_loss_weight=1.0, bptt=False):
    goal_expr = feed_dict['goal_expr']
    item_images = feed_dict['item_images']      # [S, N_obj, C, H, W]  (NCHW per object)
    item_poses = feed_dict['item_poses']        # [S, N_obj, 2]  augmented feature
    actions = feed_dict['actions']              # python list of synthetic OperatorAppliers
    action_ids = feed_dict['action_ids']        # [A] int32
    dones_np = np.asarray(feed_dict['dones'])   # host-side metadata (used for control flow)
    done = jnp.asarray(dones_np, jnp.float32)

    ctx = ForwardCtx()
    bank = LossBank()

    # --- forward_augmented_features + forward_derived_features (neural hot path) ---
    s, n_obj = item_images.shape[0], item_images.shape[1]
    x = item_images.reshape(s * n_obj, -1).astype(jnp.float32)
    preds = predicate_forward(x, params['w1'], params['b1'], params['w2'], params['b2'])
    preds = preds.reshape(s, n_obj, P_OUT)[..., :N_PRED]        # [S, N_obj, 12] probs

    # --- goal loss / accuracy ---
    if goal_expr is not None:
        pred_name, obj_name = goal_expr.strip('()').split()
        goal_pred = preds[:, OBJ_IDX[obj_name], PRED_IDX[pred_name]]
        bank.add_bce(goal_pred, done, 'goal', 1.0, goal_loss_weight)
        acc = jnp.mean(((goal_pred > 0.5) == jnp.asarray(dones_np)).astype(jnp.float32))
        ctx.add_accuracy(acc, 'goal')

    # --- prior: (not (is-<type> wall:0)) should hold ---
    wall_idx = OBJ_IDX['wall:0']
    for typ in TYPES:
        bank.add_bce(1.0 - preds[:, wall_idx, PRED_IDX[f'is-{typ}']],
                     jnp.ones((s,), jnp.float32), 'prior', 1.0, goal_loss_weight)

    objs = [k for k in OBJECT_NAMES if k != 'r' and k[0] != 'w']

    # --- pseudo-label knowledge losses ---
    if count > 500:
        for key in objs:
            oi = OBJ_IDX[key]
            # color pseudo-labeling (argmax over summed probs -> one-hot target)
            color_preds = preds[:, oi, 0:6]                                   # [S, 6]
            pseudo_color = jnp.argmax(jnp.sum(color_preds, axis=0))
            pred_cat = jnp.transpose(color_preds).reshape(-1)                 # [c0(S), c1(S), ...]
            target_cat = jnp.repeat(jax.nn.one_hot(pseudo_color, 6, dtype=jnp.float32), s)
            bank.add_bce(pred_cat, target_cat, 'knowledge', 0.1, goal_loss_weight)
            # type pseudo-labeling.  NOTE: the reference code re-uses the stale `color`
            # string as the type pseudo-label, so the type target is all-zeros (bug preserved).
            type_preds = preds[:, oi, 6:10]                                   # [S, 4]
            bank.add_bce(jnp.transpose(type_preds).reshape(-1),
                         jnp.zeros((4 * s,), jnp.float32), 'knowledge', 0.1, goal_loss_weight)

    # --- segment (task-specific) knowledge losses ---
    succ = bool(dones_np[-1])
    if task == 'open':
        open_door = None
        for action in actions:
            if action['name'] == 'toggle':
                open_door = action['arg']
        od = OBJ_IDX[open_door]
        if succ:
            pred_cat = jnp.transpose(preds[:, od, 0:6]).reshape(-1)
            target_cat = jnp.concatenate([
                (jnp.ones if str(goal_expr).find(color) > -1 else jnp.zeros)((s,), jnp.float32)
                for color in COLORS])
            bank.add_bce(pred_cat, target_cat, 'knowledge', 1.0, goal_loss_weight)
        bank.add_bce(preds[:, od, PRED_IDX['is-door']],
                     jnp.ones((s,), jnp.float32), 'knowledge', 1.0, goal_loss_weight)
        # (exists (?o - item) (is-open ?o)) -> soft max over non-robot objects.
        exists_pred = jnp.max(preds[:, 1:, PRED_IDX['is-open']], axis=1)[:-1]
        bank.add_bce(exists_pred, jnp.zeros((s - 1,), jnp.float32),
                     'knowledge', 1.0, goal_loss_weight)
    elif task in ('put', 'unlock'):
        # TODO(synk): 'put'/'unlock' branches need relational predicates (nextto,
        # robot-is-facing) and the symbolic PDSketch parser; not modeled here.
        pass

    # --- action-effect loss (SmoothL1 sum over augmented feature 'item-pose') ---
    if action_loss_weight > 0:
        deltas = params['effect_delta'][action_ids]                   # [A, 2]
        pred_pose = (item_poses[:-1] + deltas[:, None, :]).reshape(len(actions), -1)
        target_pose = item_poses[1:].reshape(len(actions), -1)
        for i, action in enumerate(actions):
            bank.add_huber(pred_pose[i], target_pose[i],
                           entries=[('a', False),
                                    (f"a/{action['name']}/item-pose", action_loss_weight)])
        # TODO(synk): bptt branch (re-running the goal expression on predicted next
        # states) requires the symbolic apply_effect machinery; bptt=False by default.

    # --- ONE fused reduction kernel over every loss term collected above ---
    bank.reduce_into(ctx)
    return ctx.finalize()


# ----------------------------- example run ------------------------------------
if __name__ == "__main__":
    key = jax.random.PRNGKey(0)
    kp, ki, kq = jax.random.split(key, 3)
    params = init_params(kp)

    item_images = jax.random.normal(ki, (S, N_OBJ, C, H, W), jnp.float32)
    item_poses = jax.random.normal(kq, (S, N_OBJ, 2), jnp.float32)
    dones = np.array([False] * (S - 1) + [True])

    actions = [
        {'name': 'forward', 'arg': 'r'},
        {'name': 'lturn', 'arg': 'r'},
        {'name': 'forward', 'arg': 'r'},
        {'name': 'rturn', 'arg': 'r'},
        {'name': 'forward', 'arg': 'r'},
        {'name': 'forward', 'arg': 'r'},
        {'name': 'toggle', 'arg': 'door:0'},
    ]
    action_ids = jnp.array([ACTION_TYPES.index(a['name']) for a in actions], jnp.int32)

    feed_dict = {
        'goal_expr': '(is-red door:0)',
        'item_images': item_images,
        'item_poses': item_poses,
        'actions': actions,
        'action_ids': action_ids,
        'dones': dones,
    }

    out = abil_forward(params, feed_dict, task='open', count=1000)
    jax.block_until_ready(out['loss'])
    for v in out['monitors'].values():
        jax.block_until_ready(v)
    print("KERNEL_OK")
</pallas_src>

<mosaic_0001>
module attributes {stable_mosaic.version = 11 : i64} {
  func.func @_predicate_kernel(%arg0: memref<64x192xf32, #tpu.memory_space<vmem>>, %arg1: memref<192x128xf32, #tpu.memory_space<vmem>>, %arg2: memref<1x128xf32, #tpu.memory_space<vmem>>, %arg3: memref<128x128xf32, #tpu.memory_space<vmem>>, %arg4: memref<1x128xf32, #tpu.memory_space<vmem>>, %arg5: memref<64x128xf32, #tpu.memory_space<vmem>>) attributes {dimension_semantics = [], scalar_prefetch = 0 : i64, scratch_operands = 0 : i64, tpu.core_type = #tpu.core_type<tc>} {
    %c0 = arith.constant 0 : index
    %c0_0 = arith.constant 0 : index
    %0 = vector.load %arg0[%c0, %c0_0] : memref<64x192xf32, #tpu.memory_space<vmem>>, vector<64x192xf32>
    %c0_1 = arith.constant 0 : index
    %c0_2 = arith.constant 0 : index
    %1 = vector.load %arg1[%c0_1, %c0_2] : memref<192x128xf32, #tpu.memory_space<vmem>>, vector<192x128xf32>
    %cst = arith.constant dense<0.000000e+00> : vector<64x128xf32>
    %2 = tpu.matmul %0, %1, %cst {dimension_numbers = #tpu.dot_dimension_numbers<[1], [0], [0], [1], [0, 0, 1, 1], [], []>} : vector<64x192xf32>, vector<192x128xf32>, vector<64x128xf32> -> vector<64x128xf32>
    %c0_3 = arith.constant 0 : index
    %c0_4 = arith.constant 0 : index
    %3 = vector.load %arg2[%c0_3, %c0_4] : memref<1x128xf32, #tpu.memory_space<vmem>>, vector<1x128xf32>
    %4 = vector.broadcast %3 : vector<1x128xf32> to vector<64x128xf32>
    %5 = arith.addf %2, %4 : vector<64x128xf32>
    %cst_5 = arith.constant 0.000000e+00 : f32
    %6 = vector.broadcast %cst_5 : f32 to vector<64x128xf32>
    %7 = arith.maximumf %5, %6 : vector<64x128xf32>
    %c0_6 = arith.constant 0 : index
    %c0_7 = arith.constant 0 : index
    %8 = vector.load %arg3[%c0_6, %c0_7] : memref<128x128xf32, #tpu.memory_space<vmem>>, vector<128x128xf32>
    %cst_8 = arith.constant dense<0.000000e+00> : vector<64x128xf32>
    %9 = tpu.matmul %7, %8, %cst_8 {dimension_numbers = #tpu.dot_dimension_numbers<[1], [0], [0], [1], [0, 0, 1, 1], [], []>} : vector<64x128xf32>, vector<128x128xf32>, vector<64x128xf32> -> vector<64x128xf32>
    %c0_9 = arith.constant 0 : index
    %c0_10 = arith.constant 0 : index
    %10 = vector.load %arg4[%c0_9, %c0_10] : memref<1x128xf32, #tpu.memory_space<vmem>>, vector<1x128xf32>
    %11 = vector.broadcast %10 : vector<1x128xf32> to vector<64x128xf32>
    %12 = arith.addf %9, %11 : vector<64x128xf32>
    %13 = arith.negf %12 : vector<64x128xf32>
    %14 = math.exp %13 : vector<64x128xf32>
    %cst_11 = arith.constant 1.000000e+00 : f32
    %15 = vector.broadcast %cst_11 : f32 to vector<64x128xf32>
    %16 = arith.addf %15, %14 : vector<64x128xf32>
    %17 = arith.divf %15, %16 : vector<64x128xf32>
    %c0_12 = arith.constant 0 : index
    %c0_13 = arith.constant 0 : index
    %18 = vector.load %arg5[%c0_12, %c0_13] : memref<64x128xf32, #tpu.memory_space<vmem>>, vector<64x128xf32>
    tpu.vector_store %arg5[%c0_12, %c0_13], %17 {strides = array<i32>} : memref<64x128xf32, #tpu.memory_space<vmem>>, vector<64x128xf32>,
    return
  }
}

</mosaic_0001>

<bundles_post_ra>
// kernel: tpu_custom_call.1
= control target key start
LH: loop header
LB: loop body
LE: loop exit
PB: predicated region body
PF: predicated region fallthrough
CT: control target
= control target key end

     0   :  { %10 = vsyncpa [#allocation3], 0  ;;  %s743_s0 = inlined_call_operand.hbm [shape: f32[64,192], index: 0, kind: input, shape index: {}]   ;;  %s744_s1 = inlined_call_operand.hbm [shape: f32[192,128], index: 1, kind: input, shape index: {}]   ;;  %s745_s2 = inlined_call_operand.vmem [shape: f32[1,128], index: 2, kind: input, shape index: {}]   ;;  %s746_s3 = inlined_call_operand.hbm [shape: f32[128,128], index: 3, kind: input, shape index: {}]   ;;  %s747_s4 = inlined_call_operand.vmem [shape: f32[1,128], index: 4, kind: input, shape index: {}]   ;;  %s748_s5 = inlined_call_operand.hbm [shape: f32[64,128], index: 5, kind: output, shape index: {}]  }
   0x1   :  { %11 = vsyncpa [#allocation6], 0  ;;  %s30_s20 = sshll.u32 %s744_s1, 4  ;;  %s31_s20 = int_to_ptr.hbm [resolvable:$true] %s30_s20 }
   0x2   :  { %12 = vsyncpa [#allocation4], 0  ;;  %s660_s21 = smov [#allocation5]   ;;  %s17_s25 = sshll.u32 %s743_s0, 4  ;;  %s18_s25 = int_to_ptr.hbm [resolvable:$true] %s17_s25 }
   0x3   :  { %s32_s22 = sshll.u32 %s660_s21, 4  ;;  %s661_s26 = smov 128   ;;  %s33_s22 = int_to_ptr.vmem [resolvable:$true] %s32_s22 }
   0x4   :  { %s662_s27 = smov 8   ;;  %s663_s28 = smov [#allocation2]  }
   0x5   :  { %38 = dma.hbm_to_vmem [thread:$0]  %s31_s20, 3072, %s33_s22, [#allocation6], %s661_s26, %s661_s26, %s662_s27  }
   0x6   :  { %s19_s29 = sshll.u32 %s663_s28, 4  ;;  %s664_s1 = smov 256   ;;  %s20_s29 = int_to_ptr.vmem [resolvable:$true] %s19_s29 }
   0x7   :  { %s665_s30 = smov 16   ;;  %s45_s8 = sshll.u32 %s746_s3, 4  ;;  %s46_s8 = int_to_ptr.hbm [resolvable:$true] %s45_s8 }
   0x8   :  { %25 = dma.hbm_to_vmem [thread:$0]  %s18_s25, 2048, %s20_s29, [#allocation3], %s664_s1, %s664_s1, %s665_s30  }
   0x9   :  { %s666_s9 = smov [#allocation7]  }
   0xa   :  { %s47_s0 = sshll.u32 %s666_s9, 4  ;;  %s48_s0 = int_to_ptr.vmem [resolvable:$true] %s47_s0 }
   0xb   :  { %53 = dma.hbm_to_vmem [thread:$0]  %s46_s8, 2048, %s48_s0, [#allocation6], %s661_s26, %s661_s26, %s662_s27  }
   0xc   :  { %654 = dma.done.wait [#allocation3], 2048  }
   0xd   :  { %655 = vsyncadd [#allocation3], 4294965248 }
   0xe   :  { %656 = dma.done.wait [#allocation6], 5120  }
   0xf   :  { %657 = vsyncadd [#allocation6], 4294962176  ;;  %v99_v0 = vld [vmem:[#allocation5 + $0x78] sm:$0xff]  ;;  %v98_v2 = vld [vmem:[#allocation5 + $0x70] sm:$0xff]  ;;  %vm112_vm0 = vcmask 523264   ;;  %s454_s15 = sshll.u32 %s748_s5, 4  ;;  %s455_s15 = int_to_ptr.hbm [resolvable:$true] %s454_s15 }
  0x10   :  { %v107_v1 = vld [vmem:[#allocation5 + $0xb8] sm:$0xff]  ;;  %137 = vmatpush.msra.mxu0 %v99_v0  ;;  %v106_v3 = vld [vmem:[#allocation5 + $0xb0] sm:$0xff]  ;;  %v97_v4 = vld [vmem:[#allocation5 + $0x68] sm:$0xff]  ;;  %484 = vmatpush.msra.mxu3 %v99_v0 }
  0x11   :  { %186 = vmatpush.msra.mxu1 %v107_v1  ;;  %v105_v5 = vld [vmem:[#allocation5 + $0xa8] sm:$0xff]  ;;  %v96_v6 = vld [vmem:[#allocation5 + $0x60] sm:$0xff]  ;;  %v95_v8 = vld [vmem:[#allocation5 + $0x58] sm:$0xff] }
  0x12   :  { %138 = vmatpush.msra.mxu0 %v98_v2  ;;  %v104_v7 = vld [vmem:[#allocation5 + $0xa0] sm:$0xff]  ;;  %485 = vmatpush.msra.mxu3 %v98_v2  ;;  %v103_v9 = vld [vmem:[#allocation5 + $0x98] sm:$0xff]  ;;  %v94_v10 = vld [vmem:[#allocation5 + $0x50] sm:$0xff] }
  0x13   :  { %187 = vmatpush.msra.mxu1 %v106_v3  ;;  %v102_v11 = vld [vmem:[#allocation5 + $0x90] sm:$0xff]  ;;  %v93_v12 = vld [vmem:[#allocation5 + $0x48] sm:$0xff]  ;;  %v92_v14 = vld [vmem:[#allocation5 + $0x40] sm:$0xff] }
  0x14   :  { %139 = vmatpush.msra.mxu0 %v97_v4  ;;  %486 = vmatpush.msra.mxu3 %v97_v4  ;;  %v101_v13 = vld [vmem:[#allocation5 + $0x88] sm:$0xff]  ;;  %v100_v15 = vld [vmem:[#allocation5 + $0x80] sm:$0xff]  ;;  %v91_v17 = vld [vmem:[#allocation5 + $0x38] sm:$0xff] }
  0x15   :  { %188 = vmatpush.msra.mxu1 %v105_v5  ;;  %v69_v16 = vld [vmem:[#allocation2 + $0x8] sm:$0xff]  ;;  %v90_v18 = vld [vmem:[#allocation5 + $0x30] sm:$0xff]  ;;  %v88_v20 = vld [vmem:[#allocation5 + $0x20] sm:$0xff] }
  0x16   :  { %140 = vmatpush.msra.mxu0 %v96_v6  ;;  %487 = vmatpush.msra.mxu3 %v96_v6  ;;  %v89_v19 = vld [vmem:[#allocation5 + $0x28] sm:$0xff]  ;;  %v71_v21 = vld [vmem:[#allocation2 + $0x18] sm:$0xff]  ;;  %v86_v23 = vld [vmem:[#allocation5 + $0x10] sm:$0xff] }
  0x17   :  { %189 = vmatpush.msra.mxu1 %v104_v7  ;;  %v87_v22 = vld [vmem:[#allocation5 + $0x18] sm:$0xff]  ;;  %v85_v24 = vld [vmem:[#allocation5 + $0x8] sm:$0xff]  ;;  %v84_v25 = vld [vmem:[#allocation5] sm:$0xff] }
  0x18   :  { %141 = vmatpush.msra.mxu0 %v95_v8  ;;  %488 = vmatpush.msra.mxu3 %v95_v8  ;;  %v68_v26 = vld [vmem:[#allocation2] sm:$0xff]  ;;  %v73_v27 = vld [vmem:[#allocation2 + $0x28] sm:$0xff]  ;;  %v70_v29 = vld [vmem:[#allocation2 + $0x10] sm:$0xff] }
  0x19   :  { %190 = vmatpush.msra.mxu1 %v103_v9  ;;  %v80_v28 = vld [vmem:[#allocation2 + $0x60] sm:$0xff]  ;;  %v75_v30 = vld [vmem:[#allocation2 + $0x38] sm:$0xff]  ;;  %v82_v31 = vld [vmem:[#allocation2 + $0x70] sm:$0xff] }
  0x1a   :  { %142 = vmatpush.msra.mxu0 %v94_v10  ;;  %489 = vmatpush.msra.mxu3 %v94_v10  ;;  %v242_v32 = vld [vmem:[#allocation7 + $0x78] sm:$0xff]  ;;  %v241_v33 = vld [vmem:[#allocation7 + $0x70] sm:$0xff]  ;;  %v240_v34 = vld [vmem:[#allocation7 + $0x68] sm:$0xff] }
  0x1b   :  { %191 = vmatpush.msra.mxu1 %v102_v11  ;;  %247 = vmatpush.msra.mxu2 %v242_v32  ;;  %v239_v35 = vld [vmem:[#allocation7 + $0x60] sm:$0xff]  ;;  %v77_v37 = vld [vmem:[#allocation2 + $0x48] sm:$0xff]  ;;  %v74_v38 = vld [vmem:[#allocation2 + $0x30] sm:$0xff] }
  0x1c   :  { %143 = vmatpush.msra.mxu0 %v93_v12  ;;  %490 = vmatpush.msra.mxu3 %v93_v12  ;;  %v72_v36 = vld [vmem:[#allocation2 + $0x20] sm:$0xff]  ;;  %v79_v39 = vld [vmem:[#allocation2 + $0x58] sm:$0xff]  ;;  %v81_v41 = vld [vmem:[#allocation2 + $0x68] sm:$0xff] }
  0x1d   :  { %192 = vmatpush.msra.mxu1 %v101_v13  ;;  %248 = vmatpush.msra.mxu2 %v241_v33  ;;  %v76_v40 = vld [vmem:[#allocation2 + $0x40] sm:$0xff]  ;;  %v78_v42 = vld [vmem:[#allocation2 + $0x50] sm:$0xff]  ;;  %v83_v43 = vld [vmem:[#allocation2 + $0x78] sm:$0xff] }
  0x1e   :  { %144 = vmatpush.msra.mxu0 %v92_v14  ;;  %491 = vmatpush.msra.mxu3 %v92_v14  ;;  %v238_v44 = vld [vmem:[#allocation7 + $0x58] sm:$0xff]  ;;  %v237_v45 = vld [vmem:[#allocation7 + $0x50] sm:$0xff]  ;;  %v236_v46 = vld [vmem:[#allocation7 + $0x48] sm:$0xff] }
  0x1f   :  { %193 = vmatpush.msra.mxu1 %v100_v15  ;;  %249 = vmatpush.msra.mxu2 %v240_v34  ;;  %v235_v47 = vld [vmem:[#allocation7 + $0x40] sm:$0xff]  ;;  %v234_v48 = vld [vmem:[#allocation7 + $0x38] sm:$0xff]  ;;  %v233_v49 = vld [vmem:[#allocation7 + $0x30] sm:$0xff] }
  0x20   :  { %468 = vmatmul.msk.f32.vlgmr.msra.gmra.mxu1 %vm112_vm0, %v69_v16  ;;  %145 = vmatpush.msra.mxu0 %v91_v17  ;;  %v232_v50 = vld [vmem:[#allocation7 + $0x28] sm:$0xff]  ;;  %v231_v51 = vld [vmem:[#allocation7 + $0x20] sm:$0xff]  ;;  %v230_v52 = vld [vmem:[#allocation7 + $0x18] sm:$0xff] }
  0x21   :  { %492 = vmatpush.msra.mxu3 %v91_v17  ;;  %250 = vmatpush.msra.mxu2 %v239_v35  ;;  %v229_v53 = vld [vmem:[#allocation7 + $0x10] sm:$0xff]  ;;  %v228_v54 = vld [vmem:[#allocation7 + $0x8] sm:$0xff]  ;;  %v227_v55 = vld [vmem:[#allocation7] sm:$0xff] }
  0x22   :  { %146 = vmatpush.msra.mxu0 %v90_v18  ;;  %v524_v58 = vld [vmem:[%s745_s2] ss:$0 sm:$0xff] }
  0x23   :  { %493 = vmatpush.msra.mxu3 %v90_v18  ;;  %251 = vmatpush.msra.mxu2 %v238_v44 }
  0x24   :  { %147 = vmatpush.msra.mxu0 %v89_v19 }
  0x25   :  { %494 = vmatpush.msra.mxu3 %v89_v19  ;;  %252 = vmatpush.msra.mxu2 %v237_v45 }
  0x26   :  { %148 = vmatpush.msra.mxu0 %v88_v20 }
  0x27   :  { %495 = vmatpush.msra.mxu3 %v88_v20  ;;  %253 = vmatpush.msra.mxu2 %v236_v46 }
  0x28   :  { %469 = vmatmul.msk.f32.gmra.mxu1 %vm112_vm0, %v71_v21  ;;  %149 = vmatpush.msra.mxu0 %v87_v22 }
  0x29   :  { %496 = vmatpush.msra.mxu3 %v87_v22  ;;  %254 = vmatpush.msra.mxu2 %v235_v47 }
  0x2a   :  { %150 = vmatpush.msra.mxu0 %v86_v23 }
  0x2b   :  { %497 = vmatpush.msra.mxu3 %v86_v23  ;;  %255 = vmatpush.msra.mxu2 %v234_v48 }
  0x2c   :  { %151 = vmatpush.msra.mxu0 %v85_v24 }
  0x2d   :  { %498 = vmatpush.msra.mxu3 %v85_v24  ;;  %256 = vmatpush.msra.mxu2 %v233_v49 }
  0x2e   :  { %152 = vmatpush.msra.mxu0 %v84_v25 }
  0x2f   :  { %153 = vmatmul.f32.vlgmr.msra.gmra.mxu0 %v68_v26  ;;  %499 = vmatpush.msra.mxu3 %v84_v25 }
  0x30   :  { %470 = vmatmul.msk.f32.gmra.mxu1 %vm112_vm0, %v73_v27  ;;  %171 = vmatmul.f32.vlgmr.msra.gmra.mxu3 %v80_v28 }
  0x31   :  { %500 = vmatpush.msrb.mxu3 %v242_v32  ;;  %257 = vmatpush.msra.mxu2 %v232_v50 }
  0x33   :  { %501 = vmatpush.msrb.mxu3 %v241_v33  ;;  %258 = vmatpush.msra.mxu2 %v231_v51  ;;  %v727_v33 = vld [vmem:[%s747_s4] ss:$0 sm:$0xff]  ;;  %s667_s4 = smov [#allocation8]  }
  0x34   :  { %s452_s12 = sshll.u32 %s667_s4, 4  ;;  %s453_s12 = int_to_ptr.vmem [resolvable:$true] %s452_s12 }
  0x35   :  { %502 = vmatpush.msrb.mxu3 %v240_v34  ;;  %259 = vmatpush.msra.mxu2 %v230_v52 }
  0x37   :  { %156 = vmatmul.f32.gmra.mxu0 %v70_v29  ;;  %503 = vmatpush.msrb.mxu3 %v239_v35 }
  0x38   :  { %471 = vmatmul.msk.f32.gmra.mxu1 %vm112_vm0, %v75_v30  ;;  %174 = vmatmul.f32.gmra.mxu3 %v82_v31 }
  0x39   :  { %504 = vmatpush.msrb.mxu3 %v238_v44  ;;  %260 = vmatpush.msra.mxu2 %v229_v53 }
  0x3b   :  { %505 = vmatpush.msrb.mxu3 %v237_v45  ;;  %261 = vmatpush.msra.mxu2 %v228_v54 }
  0x3d   :  { %506 = vmatpush.msrb.mxu3 %v236_v46  ;;  %262 = vmatpush.msra.mxu2 %v227_v55 }
  0x3f   :  { %159 = vmatmul.f32.gmra.mxu0 %v72_v36  ;;  %507 = vmatpush.msrb.mxu3 %v235_v47 }
  0x40   :  { %472 = vmatmul.msk.f32.gmra.mxu1 %vm112_vm0, %v77_v37 }
  0x41   :  { %508 = vmatpush.msrb.mxu3 %v234_v48 }
  0x43   :  { %509 = vmatpush.msrb.mxu3 %v233_v49 }
  0x45   :  { %510 = vmatpush.msrb.mxu3 %v232_v50 }
  0x47   :  { %162 = vmatmul.f32.gmra.mxu0 %v74_v38  ;;  %511 = vmatpush.msrb.mxu3 %v231_v51 }
  0x48   :  { %473 = vmatmul.msk.f32.gmra.mxu1 %vm112_vm0, %v79_v39 }
  0x49   :  { %512 = vmatpush.msrb.mxu3 %v230_v52 }
  0x4b   :  { %513 = vmatpush.msrb.mxu3 %v229_v53 }
  0x4d   :  { %514 = vmatpush.msrb.mxu3 %v228_v54 }
  0x4f   :  { %165 = vmatmul.f32.gmra.mxu0 %v76_v40  ;;  %515 = vmatpush.msrb.mxu3 %v227_v55 }
  0x50   :  { %474 = vmatmul.msk.f32.gmra.mxu1 %vm112_vm0, %v81_v41 }
  0x57   :  { %168 = vmatmul.f32.gmra.mxu0 %v78_v42 }
  0x58   :  { %475 = vmatmul.msk.f32.gmra.mxu1 %vm112_vm0, %v83_v43 }
  0x9d   :  { %v195_v56 = vpop.f32.mrf.mxu1 }
  0xa5   :  { %v198_v57 = vpop.f32.mrf.mxu1 }
  0xac   :  { %v154_v59 = vpop.f32.mrf.mxu0 }
  0xad   :  { %v201_v60 = vpop.f32.mrf.mxu1  ;;  %v155_v61 = vadd.f32 %v524_v58, %v154_v59 }
  0xaf   :  { %v196_v62 = vadd.f32 %v195_v56, %v155_v61 }
  0xb1   :  { %v219_v63 = vmax.f32 %v196_v62, 0.0 }
  0xb3   :  { %263 = vmatmul.f32.vlgmr.msra.gmra.mxu2 %v219_v63  ;;  %v172_v10 = vpop.f32.mrf.mxu3 }
  0xb4   :  { %v157_v0 = vpop.f32.mrf.mxu0  ;;  %v173_v15 = vadd.f32 %v524_v58, %v172_v10 }
  0xb5   :  { %v204_v1 = vpop.f32.mrf.mxu1  ;;  %v158_v2 = vadd.f32 %v524_v58, %v157_v0 }
  0xb7   :  { %v199_v3 = vadd.f32 %v198_v57, %v158_v2 }
  0xb9   :  { %v220_v4 = vmax.f32 %v199_v3, 0.0 }
  0xbb   :  { %266 = vmatmul.f32.gmra.mxu2 %v220_v4  ;;  %v175_v21 = vpop.f32.mrf.mxu3 }
  0xbc   :  { %v160_v5 = vpop.f32.mrf.mxu0  ;;  %v176_v24 = vadd.f32 %v524_v58, %v175_v21 }
  0xbd   :  { %v207_v6 = vpop.f32.mrf.mxu1  ;;  %v161_v7 = vadd.f32 %v524_v58, %v160_v5 }
  0xbf   :  { %v202_v8 = vadd.f32 %v201_v60, %v161_v7 }
  0xc1   :  { %v221_v9 = vmax.f32 %v202_v8, 0.0 }
  0xc3   :  { %269 = vmatmul.f32.gmra.mxu2 %v221_v9 }
  0xc4   :  { %v163_v11 = vpop.f32.mrf.mxu0 }
  0xc5   :  { %v210_v12 = vpop.f32.mrf.mxu1  ;;  %v164_v13 = vadd.f32 %v524_v58, %v163_v11 }
  0xc7   :  { %v205_v14 = vadd.f32 %v204_v1, %v164_v13 }
  0xc9   :  { %v222_v16 = vmax.f32 %v205_v14, 0.0 }
  0xcb   :  { %272 = vmatmul.f32.gmra.mxu2 %v222_v16 }
  0xcc   :  { %v166_v17 = vpop.f32.mrf.mxu0 }
  0xcd   :  { %v213_v18 = vpop.f32.mrf.mxu1  ;;  %v167_v19 = vadd.f32 %v524_v58, %v166_v17 }
  0xce   :  { %v214_v20 = vadd.f32 %v213_v18, %v173_v15 }
  0xcf   :  { %v208_v23 = vadd.f32 %v207_v6, %v167_v19 }
  0xd0   :  { %v225_v22 = vmax.f32 %v214_v20, 0.0 }
  0xd1   :  { %v223_v25 = vmax.f32 %v208_v23, 0.0 }
  0xd2   :  { %281 = vmatmul.f32.vlgmr.msrb.gmra.mxu3 %v225_v22 }
  0xd3   :  { %275 = vmatmul.f32.gmra.mxu2 %v223_v25 }
  0xd4   :  { %v169_v26 = vpop.f32.mrf.mxu0 }
  0xd5   :  { %v216_v27 = vpop.f32.mrf.mxu1  ;;  %v170_v28 = vadd.f32 %v524_v58, %v169_v26 }
  0xd6   :  { %v217_v29 = vadd.f32 %v216_v27, %v176_v24 }
  0xd7   :  { %v211_v31 = vadd.f32 %v210_v12, %v170_v28 }
  0xd8   :  { %v226_v30 = vmax.f32 %v217_v29, 0.0 }
  0xd9   :  { %v224_v32 = vmax.f32 %v211_v31, 0.0 }
  0xda   :  { %284 = vmatmul.f32.gmra.mxu3 %v226_v30 }
  0xdb   :  { %278 = vmatmul.f32.gmra.mxu2 %v224_v32 }
 0x136   :  { %v264_v34 = vpop.f32.mrf.mxu2 }
 0x137   :  { %v265_v35 = vadd.f32 %v727_v33, %v264_v34 }
 0x139   :  { %v476_v36 = vmul.f32 -1.442695, %v265_v35 }
 0x13b   :  { %526 = vpow2.f32 %v476_v36 }
 0x13e   :  { %v267_v37 = vpop.f32.mrf.mxu2 }
 0x13f   :  { %v268_v38 = vadd.f32 %v727_v33, %v267_v37 }
 0x141   :  { %v527_v39 = vpop.eup %526  ;;  %v477_v40 = vmul.f32 -1.442695, %v268_v38 }
 0x142   :  { %v312_v41 = vadd.f32 1.0, %v527_v39 }
 0x143   :  { %528 = vpow2.f32 %v477_v40 }
 0x144   :  { %530 = vrcp.f32 %v312_v41  ;;  %v331_v50 = vand.u32 2147483648, %v312_v41  ;;  %v329_v53 = vand.u32 2147483647, %v312_v41  ;;  %vm325_vm2 = vweird.f32 %v312_v41 }
 0x146   :  { %v270_v42 = vpop.f32.mrf.mxu2  ;;  %v332_v59 = vor.u32 1.1754944e-38, %v331_v50  ;;  %vm330_vm4 = vcmp.eq.f32.partialorder %v329_v53, 8.507059e+37 }
 0x147   :  { %v271_v43 = vadd.f32 %v727_v33, %v270_v42 }
 0x149   :  { %v529_v44 = vpop.eup %528  ;;  %v478_v45 = vmul.f32 -1.442695, %v271_v43 }
 0x14a   :  { %v531_v46 = vpop.eup %530  ;;  %v313_v47 = vadd.f32 1.0, %v529_v44 }
 0x14b   :  { %v321_v48 = vmul.f32 %v531_v46, %v312_v41  ;;  %532 = vpow2.f32 %v478_v45  ;;  %vm326_vm1 = vweird.f32 %v531_v46 }
 0x14c   :  { %534 = vrcp.f32 %v313_v47  ;;  %vm327_vm3 = vmor %vm325_vm2, %vm326_vm1  ;;  %v344_v3 = vand.u32 2147483647, %v313_v47  ;;  %v346_v4 = vand.u32 2147483648, %v313_v47  ;;  %vm340_vm6 = vweird.f32 %v313_v47 }
 0x14d   :  { %v322_v49 = vsub.f32 1.0, %v321_v48 }
 0x14e   :  { %v273_v51 = vpop.f32.mrf.mxu2  ;;  %v347_v13 = vor.u32 1.1754944e-38, %v346_v4  ;;  %vm345_vm8 = vcmp.eq.f32.partialorder %v344_v3, 8.507059e+37 }
 0x14f   :  { %v323_v52 = vmul.f32 %v531_v46, %v322_v49  ;;  %v274_v54 = vadd.f32 %v727_v33, %v273_v51 }
 0x151   :  { %v533_v55 = vpop.eup %532  ;;  %v324_v56 = vadd.f32 %v531_v46, %v323_v52  ;;  %v479_v57 = vmul.f32 -1.442695, %v274_v54 }
 0x152   :  { %v535_v58 = vpop.eup %534  ;;  %v314_v60 = vadd.f32 1.0, %v533_v55 }
 0x153   :  { %v328_v61 = vsel %vm327_vm3, %v531_v46, %v324_v56  ;;  %v336_v62 = vmul.f32 %v535_v58, %v313_v47  ;;  %536 = vpow2.f32 %v479_v57  ;;  %vm341_vm5 = vweird.f32 %v535_v58 }
 0x154   :  { %v333_v63 = vsel %vm330_vm4, %v332_v59, %v328_v61  ;;  %538 = vrcp.f32 %v314_v60  ;;  %vm342_vm7 = vmor %vm340_vm6, %vm341_vm5  ;;  %v359_v21 = vand.u32 2147483647, %v314_v60  ;;  %v361_v22 = vand.u32 2147483648, %v314_v60 }
 0x155   :  { %v282_v0 = vpop.f32.mrf.mxu3  ;;  %440 = vst [vmem:[#allocation8] sm:$0xff] %v333_v63  ;;  %v337_v1 = vsub.f32 1.0, %v336_v62  ;;  %vm355_vm10 = vweird.f32 %v314_v60 }
 0x156   :  { %v283_v2 = vadd.f32 %v727_v33, %v282_v0  ;;  %v276_v5 = vpop.f32.mrf.mxu2  ;;  %v362_v34 = vor.u32 1.1754944e-38, %v361_v22  ;;  %vm360_vm12 = vcmp.eq.f32.partialorder %v359_v21, 8.507059e+37 }
 0x157   :  { %v338_v6 = vmul.f32 %v535_v58, %v337_v1  ;;  %v277_v8 = vadd.f32 %v727_v33, %v276_v5 }
 0x158   :  { %v482_v7 = vmul.f32 -1.442695, %v283_v2 }
 0x159   :  { %v537_v9 = vpop.eup %536  ;;  %v339_v10 = vadd.f32 %v535_v58, %v338_v6  ;;  %v480_v11 = vmul.f32 -1.442695, %v277_v8 }
 0x15a   :  { %540 = vpow2.f32 %v482_v7  ;;  %v539_v12 = vpop.eup %538  ;;  %v315_v14 = vadd.f32 1.0, %v537_v9 }
 0x15b   :  { %v343_v15 = vsel %vm342_vm7, %v535_v58, %v339_v10  ;;  %v351_v16 = vmul.f32 %v539_v12, %v314_v60  ;;  %542 = vpow2.f32 %v480_v11  ;;  %vm356_vm9 = vweird.f32 %v539_v12 }
 0x15c   :  { %v348_v17 = vsel %vm345_vm8, %v347_v13, %v343_v15  ;;  %544 = vrcp.f32 %v315_v14  ;;  %vm357_vm11 = vmor %vm355_vm10, %vm356_vm9  ;;  %v374_v42 = vand.u32 2147483647, %v315_v14  ;;  %vm370_vm14 = vweird.f32 %v315_v14 }
 0x15d   :  { %v285_v18 = vpop.f32.mrf.mxu3  ;;  %441 = vst [vmem:[#allocation8 + $0x8] sm:$0xff] %v348_v17  ;;  %v352_v19 = vsub.f32 1.0, %v351_v16 }
 0x15e   :  { %v286_v20 = vadd.f32 %v727_v33, %v285_v18  ;;  %v279_v23 = vpop.f32.mrf.mxu2  ;;  %vm375_vm0 = vcmp.eq.f32.partialorder %v374_v42, 8.507059e+37 }
 0x15f   :  { %v353_v25 = vmul.f32 %v539_v12, %v352_v19  ;;  %v280_v27 = vadd.f32 %v727_v33, %v279_v23  ;;  %v376_v33 = vand.u32 2147483648, %v315_v14 }
 0x160   :  { %v541_v24 = vpop.eup %540  ;;  %v483_v26 = vmul.f32 -1.442695, %v286_v20 }
 0x161   :  { %v318_v28 = vadd.f32 1.0, %v541_v24  ;;  %v543_v29 = vpop.eup %542  ;;  %v354_v30 = vadd.f32 %v539_v12, %v353_v25  ;;  %v481_v31 = vmul.f32 -1.442695, %v280_v27  ;;  %v377_v48 = vor.u32 1.1754944e-38, %v376_v33 }
 0x162   :  { %546 = vpow2.f32 %v483_v26  ;;  %v545_v32 = vpop.eup %544  ;;  %v316_v37 = vadd.f32 1.0, %v543_v29 }
 0x163   :  { %548 = vrcp.f32 %v318_v28  ;;  %v358_v35 = vsel %vm357_vm11, %v539_v12, %v354_v30  ;;  %v366_v36 = vmul.f32 %v545_v32, %v315_v14  ;;  %vm371_vm13 = vweird.f32 %v545_v32 }
 0x164   :  { %v363_v38 = vsel %vm360_vm12, %v362_v34, %v358_v35  ;;  %550 = vpow2.f32 %v481_v31  ;;  %vm372_vm15 = vmor %vm370_vm14, %vm371_vm13  ;;  %v421_v54 = vand.u32 2147483648, %v318_v28  ;;  %v419_v57 = vand.u32 2147483647, %v318_v28 }
 0x165   :  { %442 = vst [vmem:[#allocation8 + $0x10] sm:$0xff] %v363_v38  ;;  %v367_v39 = vsub.f32 1.0, %v366_v36  ;;  %552 = vrcp.f32 %v316_v37  ;;  %vm415_vm2 = vweird.f32 %v318_v28  ;;  %v391_v60 = vand.u32 2147483648, %v316_v37 }
 0x166   :  { %v422_v62 = vor.u32 1.1754944e-38, %v421_v54  ;;  %v389_v0 = vand.u32 2147483647, %v316_v37  ;;  %vm420_vm5 = vcmp.eq.f32.partialorder %v419_v57, 8.507059e+37  ;;  %vm385_vm6 = vweird.f32 %v316_v37 }
 0x167   :  { %v368_v41 = vmul.f32 %v545_v32, %v367_v39  ;;  %v392_v6 = vor.u32 1.1754944e-38, %v391_v60 }
 0x168   :  { %v547_v40 = vpop.eup %546  ;;  %vm390_vm8 = vcmp.eq.f32.partialorder %v389_v0, 8.507059e+37 }
 0x169   :  { %v549_v43 = vpop.eup %548  ;;  %v319_v44 = vadd.f32 1.0, %v547_v40  ;;  %v369_v45 = vadd.f32 %v545_v32, %v368_v41 }
 0x16a   :  { %v411_v46 = vmul.f32 %v549_v43, %v318_v28  ;;  %v551_v47 = vpop.eup %550  ;;  %vm416_vm1 = vweird.f32 %v549_v43 }
 0x16b   :  { %554 = vrcp.f32 %v319_v44  ;;  %v553_v49 = vpop.eup %552  ;;  %v373_v50 = vsel %vm372_vm15, %v545_v32, %v369_v45  ;;  %v317_v52 = vadd.f32 1.0, %v551_v47  ;;  %vm417_vm3 = vmor %vm415_vm2, %vm416_vm1  ;;  %v436_v9 = vand.u32 2147483648, %v319_v44 }
 0x16c   :  { %v412_v51 = vsub.f32 1.0, %v411_v46  ;;  %v378_v53 = vsel %vm375_vm0, %v377_v48, %v373_v50  ;;  %v381_v55 = vmul.f32 %v553_v49, %v316_v37  ;;  %vm386_vm4 = vweird.f32 %v553_v49 }
 0x16d   :  { %443 = vst [vmem:[#allocation8 + $0x18] sm:$0xff] %v378_v53  ;;  %556 = vrcp.f32 %v317_v52  ;;  %vm387_vm7 = vmor %vm385_vm6, %vm386_vm4  ;;  %v434_v13 = vand.u32 2147483647, %v319_v44  ;;  %vm430_vm10 = vweird.f32 %v319_v44  ;;  %v406_v16 = vand.u32 2147483648, %v317_v52 }
 0x16e   :  { %v413_v56 = vmul.f32 %v549_v43, %v412_v51  ;;  %v382_v58 = vsub.f32 1.0, %v381_v55  ;;  %v437_v17 = vor.u32 1.1754944e-38, %v436_v9  ;;  %v404_v19 = vand.u32 2147483647, %v317_v52 }
 0x16f   :  { %vm435_vm13 = vcmp.eq.f32.partialorder %v434_v13, 8.507059e+37  ;;  %vm400_vm14 = vweird.f32 %v317_v52  ;;  %v407_v23 = vor.u32 1.1754944e-38, %v406_v16 }
 0x170   :  { %v414_v59 = vadd.f32 %v549_v43, %v413_v56  ;;  %v383_v63 = vmul.f32 %v553_v49, %v382_v58  ;;  %vm405_vm0 = vcmp.eq.f32.partialorder %v404_v19, 8.507059e+37 }
 0x171   :  { %v555_v61 = vpop.eup %554 }
 0x172   :  { %v418_v1 = vsel %vm417_vm3, %v549_v43, %v414_v59  ;;  %v426_v2 = vmul.f32 %v555_v61, %v319_v44  ;;  %v384_v4 = vadd.f32 %v553_v49, %v383_v63  ;;  %vm431_vm9 = vweird.f32 %v555_v61 }
 0x173   :  { %v423_v3 = vsel %vm420_vm5, %v422_v62, %v418_v1  ;;  %v557_v5 = vpop.eup %556  ;;  %vm432_vm11 = vmor %vm430_vm10, %vm431_vm9 }
 0x174   :  { %446 = vst [vmem:[#allocation8 + $0x30] sm:$0xff] %v423_v3  ;;  %v427_v7 = vsub.f32 1.0, %v426_v2  ;;  %v388_v8 = vsel %vm387_vm7, %v553_v49, %v384_v4  ;;  %v396_v10 = vmul.f32 %v557_v5, %v317_v52  ;;  %vm401_vm12 = vweird.f32 %v557_v5 }
 0x175   :  { %v393_v11 = vsel %vm390_vm8, %v392_v6, %v388_v8  ;;  %vm402_vm15 = vmor %vm400_vm14, %vm401_vm12 }
 0x176   :  { %v428_v12 = vmul.f32 %v555_v61, %v427_v7  ;;  %444 = vst [vmem:[#allocation8 + $0x20] sm:$0xff] %v393_v11  ;;  %v397_v14 = vsub.f32 1.0, %v396_v10 }
 0x178   :  { %v429_v15 = vadd.f32 %v555_v61, %v428_v12  ;;  %v398_v18 = vmul.f32 %v557_v5, %v397_v14 }
 0x17a   :  { %v433_v20 = vsel %vm432_vm11, %v555_v61, %v429_v15  ;;  %v399_v22 = vadd.f32 %v557_v5, %v398_v18 }
 0x17b   :  { %v438_v21 = vsel %vm435_vm13, %v437_v17, %v433_v20 }
 0x17c   :  { %447 = vst [vmem:[#allocation8 + $0x38] sm:$0xff] %v438_v21  ;;  %v403_v24 = vsel %vm402_vm15, %v557_v5, %v399_v22 }
 0x17d   :  { %v408_v25 = vsel %vm405_vm0, %v407_v23, %v403_v24 }
 0x17e   :  { %445 = vst [vmem:[#allocation8 + $0x28] sm:$0xff] %v408_v25 }
 0x17f   :  { %460 = dma.vmem_to_hbm [thread:$0]  %s453_s12, 1024, %s455_s15, [#allocation4], %s661_s26, %s661_s26, %s662_s27  }
 0x180   :  { %658 = dma.done.wait [#allocation4], 1024  }
 0x181   :  { %659 = vsyncadd [#allocation4], 4294966272 }
 0x182   :  { %465 = vsyncpa [#allocation3], 1 }
 0x183   :  { %466 = vsyncpa [#allocation6], 1 }
 0x184   :  { %467 = vsyncpa [#allocation4], 1 }

</bundles_post_ra>
